<compile_context>
chip_gen: v7x
topology: tpu7x:2x2x1
jax: 0.10.0
libtpu: 0.0.40
codegen_flags: <defaults>
</compile_context>

<pallas_src>
import functools

import jax
import jax.numpy as jnp
from jax.experimental import pallas as pl
from jax.experimental.pallas import tpu as pltpu

IN_EPS = 1e-3   # InstanceNorm2d eps (module specifies eps=0.001)
BN_EPS = 1e-5   # BatchNorm2d eps (PyTorch default)


def _diff_unpool_kernel(x_up_ref, x_down_ref, w_ref, bias_ref,
                        a_scale_ref, a_shift_ref, out_ref,
                        *, n_valid, chunk, mm_dtype):
    # x_up_ref:   (1, C, Npad) f32      x_down_ref: (1, C, K) mm_dtype
    # w_ref:      (K, C) mm_dtype       bias_ref:   (K, 1) f32
    # a_scale/a_shift_ref: (C, 1) f32 (BN eval folded)
    # out_ref:    (1, C, Npad) f32
    _, C, n_pad = x_up_ref.shape
    n_chunks = n_pad // chunk
    inv_n = 1.0 / float(n_valid)

    # Loop-invariant loads hoisted once per grid step.
    w = w_ref[...]                       # [K, C]  mm_dtype
    bias = bias_ref[...]                 # [K, 1]  f32
    a_scale = a_scale_ref[...]           # [C, 1]  f32
    a_shift = a_shift_ref[...]           # [C, 1]  f32
    xd = x_down_ref[0]                   # [C, K]  mm_dtype

    # --- Pass 1: chunked InstanceNorm statistics, exact f32 on the VPU. ---
    def stats_body(ci, carry):
        s1, s2 = carry
        c0 = pl.multiple_of(ci * chunk, 128)
        xc = x_up_ref[0, :, pl.ds(c0, chunk)]                    # [C, chunk]
        s1 = s1 + jnp.sum(xc, axis=1, keepdims=True)
        s2 = s2 + jnp.sum(xc * xc, axis=1, keepdims=True)
        return s1, s2

    zeros = jnp.zeros((C, 1), jnp.float32)
    s1, s2 = jax.lax.fori_loop(0, n_chunks, stats_body, (zeros, zeros))

    # Zero padding beyond n_valid contributes nothing; divide by the true N.
    mean = s1 * inv_n
    var = jnp.maximum(s2 * inv_n - mean * mean, 0.0)

    # InstanceNorm + BatchNorm(eval) folded into one per-channel affine.
    a = jax.lax.rsqrt(var + IN_EPS) * a_scale                    # [C, 1]
    b = a_shift - mean * a                                       # [C, 1]

    # --- Pass 2: affine+ReLU -> conv1x1 -> softmax(K) -> matmul, per chunk. ---
    def chunk_body(ci, _):
        c0 = pl.multiple_of(ci * chunk, 128)
        xc = x_up_ref[0, :, pl.ds(c0, chunk)]                    # [C, chunk]
        yc = jnp.maximum(xc * a + b, 0.0)                        # fused IN+BN+ReLU

        embed = jnp.dot(w, yc.astype(mm_dtype),
                        preferred_element_type=jnp.float32) + bias   # [K, chunk]

        # Softmax over K (sublane axis), kept in f32 (v5e-safe VPU/EUP path).
        m = jnp.max(embed, axis=0, keepdims=True)                # [1, chunk]
        e = jnp.exp(embed - m)                                   # [K, chunk]
        denom = jnp.sum(e, axis=0, keepdims=True)                # [1, chunk]
        r = pl.reciprocal(denom, approx=True)
        r = r * (2.0 - denom * r)                                # Newton refine

        # Deferred normalization: column scaling commutes with x_down @ e,
        # so scale the [C, chunk] result instead of the [K, chunk] probs.
        oc = jnp.dot(xd, e.astype(mm_dtype),
                     preferred_element_type=jnp.float32) * r     # [C, chunk]
        out_ref[0, :, pl.ds(c0, chunk)] = oc
        return 0

    jax.lax.fori_loop(0, n_chunks, chunk_body, 0)


def _pick_chunk(n_pad):
    """Largest multiple of 128 <= 512 that divides n_pad."""
    m = n_pad // 128
    for d in (4, 3, 2, 1):
        if m % d == 0:
            return 128 * d
    return 128


def _physical_vmem_bytes():
    try:
        return int(pltpu.get_tpu_info().vmem_capacity_bytes)
    except Exception:
        return 64 << 20   # conservative (v7x) fallback


@functools.partial(jax.jit, static_argnames=("use_bf16_matmul",))
def diff_unpool(x_up, x_down, conv_w, conv_b, bn_gamma, bn_beta,
                bn_rmean, bn_rvar, *, use_bf16_matmul=True):
    """x_up: [B,C,N,1], x_down: [B,C,K,1] -> out: [B,C,N,1] (float32)."""
    B, C, N, _ = x_up.shape
    K = x_down.shape[2]
    mm_dtype = jnp.bfloat16 if use_bf16_matmul else jnp.float32
    mm_itemsize = 2 if use_bf16_matmul else 4

    xu = x_up[..., 0].astype(jnp.float32)              # [B, C, N]
    xd = x_down[..., 0].astype(mm_dtype)               # [B, C, K]

    # Pad the lane axis to a multiple of 128 for lane-dense loads/stores.
    n_pad = ((N + 127) // 128) * 128
    if n_pad != N:
        xu = jnp.pad(xu, ((0, 0), (0, 0), (0, n_pad - N)))

    # Fold BatchNorm (eval) into per-channel scale/shift, shaped [C, 1].
    bn_scale = (bn_gamma / jnp.sqrt(bn_rvar + BN_EPS)).astype(jnp.float32)
    bn_shift = (bn_beta - bn_rmean * bn_scale).astype(jnp.float32)
    bn_scale = bn_scale.reshape(C, 1)
    bn_shift = bn_shift.reshape(C, 1)

    w2d = conv_w.reshape(K, C).astype(mm_dtype)        # [K, C]
    b2d = conv_b.reshape(K, 1).astype(jnp.float32)     # [K, 1]

    chunk = _pick_chunk(n_pad)

    # VMEM budget: double-buffered in/out blocks (real itemsizes) + params +
    # one set of in-flight intermediates + headroom, capped at ~70% of the
    # physical VMEM (leaves room for Mosaic internal scratch, v7x-safe).
    blk_in = C * n_pad * 4 + C * K * mm_itemsize
    blk_out = C * n_pad * 4
    param_bytes = K * C * mm_itemsize + K * 4 + 2 * C * 4
    interm_bytes = (3 * C * chunk + 4 * K * chunk) * 4
    vmem_bytes = 2 * (blk_in + blk_out) + param_bytes + interm_bytes + (4 << 20)
    vmem_cap = int(0.7 * _physical_vmem_bytes())
    vmem_bytes = int(min(max(vmem_bytes, 32 << 20), vmem_cap))

    kernel = functools.partial(_diff_unpool_kernel, n_valid=N, chunk=chunk,
                               mm_dtype=mm_dtype)

    out = pl.pallas_call(
        kernel,
        out_shape=jax.ShapeDtypeStruct((B, C, n_pad), jnp.float32),
        grid_spec=pltpu.PrefetchScalarGridSpec(
            num_scalar_prefetch=0,
            grid=(B,),
            in_specs=[
                pl.BlockSpec((1, C, n_pad), lambda b: (b, 0, 0)),   # x_up
                pl.BlockSpec((1, C, K), lambda b: (b, 0, 0)),       # x_down
                pl.BlockSpec((K, C), lambda b: (0, 0)),             # conv W
                pl.BlockSpec((K, 1), lambda b: (0, 0)),             # conv bias
                pl.BlockSpec((C, 1), lambda b: (0, 0)),             # folded scale
                pl.BlockSpec((C, 1), lambda b: (0, 0)),             # folded shift
            ],
            out_specs=pl.BlockSpec((1, C, n_pad), lambda b: (b, 0, 0)),
        ),
        compiler_params=pltpu.CompilerParams(
            dimension_semantics=("parallel",),
            vmem_limit_bytes=vmem_bytes,
        ),
    )(xu, xd, w2d, b2d, bn_scale, bn_shift)

    return out[:, :, :N][..., None]                     # [B, C, N, 1]


def diff_unpool_reference(x_up, x_down, conv_w, conv_b, bn_gamma, bn_beta,
                          bn_rmean, bn_rvar):
    """Pure-JAX reference of the PyTorch forward (BN in eval mode)."""
    x = x_up[..., 0].astype(jnp.float32)                # [B, C, N]
    mean = x.mean(axis=2, keepdims=True)
    var = ((x - mean) ** 2).mean(axis=2, keepdims=True)
    y = (x - mean) / jnp.sqrt(var + IN_EPS)
    y = ((y - bn_rmean[None, :, None]) /
         jnp.sqrt(bn_rvar[None, :, None] + BN_EPS)) * \
        bn_gamma[None, :, None] + bn_beta[None, :, None]
    y = jnp.maximum(y, 0.0)
    K, C = conv_w.shape[0], conv_w.shape[1]
    embed = jnp.einsum('kc,bcn->bkn', conv_w.reshape(K, C), y) + \
        conv_b[None, :, None]
    s = jax.nn.softmax(embed, axis=1)
    out = jnp.einsum('bck,bkn->bcn', x_down[..., 0].astype(jnp.float32), s)
    return out[..., None]


def _make_inputs(key, B, C, N, K):
    k1, k2, k3, k4, k5, k6 = jax.random.split(key, 6)
    x_up = jax.random.normal(k1, (B, C, N, 1), dtype=jnp.float32)
    x_down = jax.random.normal(k2, (B, C, K, 1), dtype=jnp.float32)
    conv_w = jax.random.normal(k3, (K, C, 1, 1), dtype=jnp.float32) * 0.1
    conv_b = jax.random.normal(k4, (K,), dtype=jnp.float32) * 0.1
    bn_gamma = 1.0 + 0.1 * jax.random.normal(k5, (C,), dtype=jnp.float32)
    bn_beta = 0.1 * jax.random.normal(k6, (C,), dtype=jnp.float32)
    bn_rmean = jnp.zeros((C,), dtype=jnp.float32)
    bn_rvar = jnp.ones((C,), dtype=jnp.float32)
    return (x_up, x_down, conv_w, conv_b, bn_gamma, bn_beta, bn_rmean, bn_rvar)


if __name__ == "__main__":
    key = jax.random.PRNGKey(0)
    k_a, k_b = jax.random.split(key)

    # --- Test 1: demo shape, bf16 MXU operands (default, v6e/v7x path). ---
    B, C, N, K = 2, 32, 128, 8            # in_channel=C, output_points=K
    args = _make_inputs(k_a, B, C, N, K)

    out_bf16 = jax.block_until_ready(diff_unpool(*args, use_bf16_matmul=True))
    ref = diff_unpool_reference(*args)
    assert out_bf16.shape == (B, C, N, 1)
    assert jnp.allclose(out_bf16, ref, atol=2e-2, rtol=2e-2), \
        float(jnp.max(jnp.abs(out_bf16 - ref)))

    # --- Test 1b: same inputs, exact f32 MXU path (tight tolerance). ---
    out_f32 = jax.block_until_ready(diff_unpool(*args, use_bf16_matmul=False))
    assert jnp.allclose(out_f32, ref, atol=1e-4, rtol=1e-4), \
        float(jnp.max(jnp.abs(out_f32 - ref)))

    # --- Test 2: non-128-multiple N exercises the lane-padding path. ---
    B2, C2, N2, K2 = 3, 16, 200, 8
    args2 = _make_inputs(k_b, B2, C2, N2, K2)
    out2 = jax.block_until_ready(diff_unpool(*args2, use_bf16_matmul=False))
    ref2 = diff_unpool_reference(*args2)
    assert out2.shape == (B2, C2, N2, 1)
    assert jnp.allclose(out2, ref2, atol=1e-4, rtol=1e-4), \
        float(jnp.max(jnp.abs(out2 - ref2)))

    print("KERNEL_OK")
</pallas_src>

<mosaic_0001>
module attributes {stable_mosaic.version = 11 : i64} {
  func.func @_diff_unpool_kernel(%arg0: i32, %arg1: memref<1x32x128xf32, #tpu.memory_space<vmem>>, %arg2: memref<1x32x8xbf16, #tpu.memory_space<vmem>>, %arg3: memref<8x32xbf16, #tpu.memory_space<vmem>>, %arg4: memref<8x1xf32, #tpu.memory_space<vmem>>, %arg5: memref<32x1xf32, #tpu.memory_space<vmem>>, %arg6: memref<32x1xf32, #tpu.memory_space<vmem>>, %arg7: memref<1x32x128xf32, #tpu.memory_space<vmem>>) attributes {dimension_semantics = [#tpu.dimension_semantics<parallel>], iteration_bounds = array<i64: 2>, scalar_prefetch = 0 : i64, scratch_operands = 0 : i64, tpu.core_type = #tpu.core_type<tc>, window_params = [{transform_indices = @transform_0, window_bounds = array<i64: 1, 32, 128>}, {transform_indices = @transform_1, window_bounds = array<i64: 1, 32, 8>}, {pipeline_mode = #tpu.pipeline_mode<synchronous>, transform_indices = @transform_2, window_bounds = array<i64: 8, 32>}, {pipeline_mode = #tpu.pipeline_mode<synchronous>, transform_indices = @transform_3, window_bounds = array<i64: 8, 1>}, {pipeline_mode = #tpu.pipeline_mode<synchronous>, transform_indices = @transform_4, window_bounds = array<i64: 32, 1>}, {pipeline_mode = #tpu.pipeline_mode<synchronous>, transform_indices = @transform_5, window_bounds = array<i64: 32, 1>}, {transform_indices = @transform_6, window_bounds = array<i64: 1, 32, 128>}]} {
    %c0 = arith.constant 0 : index
    %c0_0 = arith.constant 0 : index
    %0 = vector.load %arg3[%c0, %c0_0] : memref<8x32xbf16, #tpu.memory_space<vmem>>, vector<8x32xbf16>
    %c0_1 = arith.constant 0 : index
    %c0_2 = arith.constant 0 : index
    %1 = vector.load %arg4[%c0_1, %c0_2] : memref<8x1xf32, #tpu.memory_space<vmem>>, vector<8x1xf32>
    %c0_3 = arith.constant 0 : index
    %c0_4 = arith.constant 0 : index
    %2 = vector.load %arg5[%c0_3, %c0_4] : memref<32x1xf32, #tpu.memory_space<vmem>>, vector<32x1xf32>
    %c0_5 = arith.constant 0 : index
    %c0_6 = arith.constant 0 : index
    %3 = vector.load %arg6[%c0_5, %c0_6] : memref<32x1xf32, #tpu.memory_space<vmem>>, vector<32x1xf32>
    %c0_7 = arith.constant 0 : index
    %c0_8 = arith.constant 0 : index
    %c0_9 = arith.constant 0 : index
    %4 = vector.load %arg2[%c0_7, %c0_8, %c0_9] : memref<1x32x8xbf16, #tpu.memory_space<vmem>>, vector<1x32x8xbf16>
    %5 = vector.shape_cast %4 : vector<1x32x8xbf16> to vector<32x8xbf16>
    %cst = arith.constant 0.000000e+00 : f32
    %6 = vector.broadcast %cst : f32 to vector<32x1xf32>
    %c0_i32 = arith.constant 0 : i32
    %c128_i32 = arith.constant 128 : i32
    %7 = arith.muli %c0_i32, %c128_i32 : i32
    %8 = tpu.assume_multiple %7, 128 : i32
    %c0_10 = arith.constant 0 : index
    %c0_11 = arith.constant 0 : index
    %9 = arith.index_cast %8 : i32 to index
    %10 = vector.load %arg1[%c0_10, %c0_11, %9] : memref<1x32x128xf32, #tpu.memory_space<vmem>>, vector<1x32x128xf32>
    %11 = vector.shape_cast %10 : vector<1x32x128xf32> to vector<32x128xf32>
    %cst_12 = arith.constant dense<0.000000e+00> : vector<32xf32>
    %12 = vector.multi_reduction <add>, %11, %cst_12 [1] : vector<32x128xf32> to vector<32xf32>
    %13 = vector.shape_cast %12 : vector<32xf32> to vector<32x1xf32>
    %14 = arith.addf %6, %13 : vector<32x1xf32>
    %15 = arith.mulf %11, %11 : vector<32x128xf32>
    %cst_13 = arith.constant dense<0.000000e+00> : vector<32xf32>
    %16 = vector.multi_reduction <add>, %15, %cst_13 [1] : vector<32x128xf32> to vector<32xf32>
    %17 = vector.shape_cast %16 : vector<32xf32> to vector<32x1xf32>
    %18 = arith.addf %6, %17 : vector<32x1xf32>
    %c1_i32 = arith.constant 1 : i32
    %cst_14 = arith.constant 7.812500e-03 : f32
    %19 = vector.broadcast %cst_14 : f32 to vector<32x1xf32>
    %20 = arith.mulf %14, %19 : vector<32x1xf32>
    %cst_15 = arith.constant 7.812500e-03 : f32
    %21 = vector.broadcast %cst_15 : f32 to vector<32x1xf32>
    %22 = arith.mulf %18, %21 : vector<32x1xf32>
    %23 = arith.mulf %20, %20 : vector<32x1xf32>
    %24 = arith.subf %22, %23 : vector<32x1xf32>
    %cst_16 = arith.constant 0.000000e+00 : f32
    %25 = vector.broadcast %cst_16 : f32 to vector<32x1xf32>
    %26 = arith.maximumf %24, %25 : vector<32x1xf32>
    %cst_17 = arith.constant 1.000000e-03 : f32
    %27 = vector.broadcast %cst_17 : f32 to vector<32x1xf32>
    %28 = arith.addf %26, %27 : vector<32x1xf32>
    %29 = math.rsqrt %28 : vector<32x1xf32>
    %30 = arith.mulf %29, %2 : vector<32x1xf32>
    %31 = arith.mulf %20, %30 : vector<32x1xf32>
    %32 = arith.subf %3, %31 : vector<32x1xf32>
    %c0_i32_18 = arith.constant 0 : i32
    %c128_i32_19 = arith.constant 128 : i32
    %33 = arith.muli %c0_i32_18, %c128_i32_19 : i32
    %34 = tpu.assume_multiple %33, 128 : i32
    %c0_20 = arith.constant 0 : index
    %c0_21 = arith.constant 0 : index
    %35 = arith.index_cast %34 : i32 to index
    %36 = vector.load %arg1[%c0_20, %c0_21, %35] : memref<1x32x128xf32, #tpu.memory_space<vmem>>, vector<1x32x128xf32>
    %37 = vector.shape_cast %36 : vector<1x32x128xf32> to vector<32x128xf32>
    %38 = vector.broadcast %30 : vector<32x1xf32> to vector<32x128xf32>
    %39 = arith.mulf %37, %38 : vector<32x128xf32>
    %40 = vector.broadcast %32 : vector<32x1xf32> to vector<32x128xf32>
    %41 = arith.addf %39, %40 : vector<32x128xf32>
    %cst_22 = arith.constant 0.000000e+00 : f32
    %42 = vector.broadcast %cst_22 : f32 to vector<32x128xf32>
    %43 = arith.maximumf %41, %42 : vector<32x128xf32>
    %44 = arith.truncf %43 : vector<32x128xf32> to vector<32x128xbf16>
    %cst_23 = arith.constant dense<0.000000e+00> : vector<8x128xf32>
    %45 = tpu.matmul %0, %44, %cst_23 {dimension_numbers = #tpu.dot_dimension_numbers<[1], [0], [0], [1], [0, 0, 1, 1], [], []>} : vector<8x32xbf16>, vector<32x128xbf16>, vector<8x128xf32> -> vector<8x128xf32>
    %46 = vector.broadcast %1 : vector<8x1xf32> to vector<8x128xf32>
    %47 = arith.addf %45, %46 : vector<8x128xf32>
    %cst_24 = arith.constant dense<0xFF800000> : vector<128xf32>
    %48 = vector.multi_reduction <maximumf>, %47, %cst_24 [0] : vector<8x128xf32> to vector<128xf32>
    %49 = vector.shape_cast %48 : vector<128xf32> to vector<1x128xf32>
    %50 = vector.broadcast %49 : vector<1x128xf32> to vector<8x128xf32>
    %51 = arith.subf %47, %50 : vector<8x128xf32>
    %52 = math.exp %51 : vector<8x128xf32>
    %cst_25 = arith.constant dense<0.000000e+00> : vector<128xf32>
    %53 = vector.multi_reduction <add>, %52, %cst_25 [0] : vector<8x128xf32> to vector<128xf32>
    %54 = vector.shape_cast %53 : vector<128xf32> to vector<1x128xf32>
    %55 = tpu.reciprocal %54 {approx = true} : vector<1x128xf32> -> vector<1x128xf32>
    %56 = arith.mulf %54, %55 : vector<1x128xf32>
    %cst_26 = arith.constant 2.000000e+00 : f32
    %57 = vector.broadcast %cst_26 : f32 to vector<1x128xf32>
    %58 = arith.subf %57, %56 : vector<1x128xf32>
    %59 = arith.mulf %55, %58 : vector<1x128xf32>
    %60 = arith.truncf %52 : vector<8x128xf32> to vector<8x128xbf16>
    %cst_27 = arith.constant dense<0.000000e+00> : vector<32x128xf32>
    %61 = tpu.matmul %5, %60, %cst_27 {dimension_numbers = #tpu.dot_dimension_numbers<[1], [0], [0], [1], [0, 0, 1, 1], [], []>} : vector<32x8xbf16>, vector<8x128xbf16>, vector<32x128xf32> -> vector<32x128xf32>
    %62 = vector.broadcast %59 : vector<1x128xf32> to vector<32x128xf32>
    %63 = arith.mulf %61, %62 : vector<32x128xf32>
    %c0_28 = arith.constant 0 : index
    %c0_29 = arith.constant 0 : index
    %64 = arith.index_cast %34 : i32 to index
    %65 = vector.load %arg7[%c0_28, %c0_29, %64] : memref<1x32x128xf32, #tpu.memory_space<vmem>>, vector<1x32x128xf32>
    %66 = vector.shape_cast %65 : vector<1x32x128xf32> to vector<32x128xf32>
    %67 = vector.shape_cast %63 : vector<32x128xf32> to vector<1x32x128xf32>
    tpu.vector_store %arg7[%c0_28, %c0_29, %64], %67 {strides = array<i32>} : memref<1x32x128xf32, #tpu.memory_space<vmem>>, vector<1x32x128xf32>,
    %c1_i32_30 = arith.constant 1 : i32
    return
  }
  func.func @transform_0(%arg0: i32) -> (i32, i32, i32) {
    %c0_i32 = arith.constant 0 : i32
    %c0_i32_0 = arith.constant 0 : i32
    %c0_i32_1 = arith.constant 0 : i32
    return %arg0, %c0_i32, %c0_i32_0 : i32, i32, i32
  }
  func.func @transform_1(%arg0: i32) -> (i32, i32, i32) {
    %c0_i32 = arith.constant 0 : i32
    %c0_i32_0 = arith.constant 0 : i32
    %c0_i32_1 = arith.constant 0 : i32
    return %arg0, %c0_i32, %c0_i32_0 : i32, i32, i32
  }
  func.func @transform_2(%arg0: i32) -> (i32, i32) {
    %c0_i32 = arith.constant 0 : i32
    %c0_i32_0 = arith.constant 0 : i32
    %c0_i32_1 = arith.constant 0 : i32
    return %c0_i32, %c0_i32_0 : i32, i32
  }
  func.func @transform_3(%arg0: i32) -> (i32, i32) {
    %c0_i32 = arith.constant 0 : i32
    %c0_i32_0 = arith.constant 0 : i32
    %c0_i32_1 = arith.constant 0 : i32
    return %c0_i32, %c0_i32_0 : i32, i32
  }
  func.func @transform_4(%arg0: i32) -> (i32, i32) {
    %c0_i32 = arith.constant 0 : i32
    %c0_i32_0 = arith.constant 0 : i32
    %c0_i32_1 = arith.constant 0 : i32
    return %c0_i32, %c0_i32_0 : i32, i32
  }
  func.func @transform_5(%arg0: i32) -> (i32, i32) {
    %c0_i32 = arith.constant 0 : i32
    %c0_i32_0 = arith.constant 0 : i32
    %c0_i32_1 = arith.constant 0 : i32
    return %c0_i32, %c0_i32_0 : i32, i32
  }
  func.func @transform_6(%arg0: i32) -> (i32, i32, i32) {
    %c0_i32 = arith.constant 0 : i32
    %c0_i32_0 = arith.constant 0 : i32
    %c0_i32_1 = arith.constant 0 : i32
    return %arg0, %c0_i32, %c0_i32_0 : i32, i32, i32
  }
}

</mosaic_0001>

<bundles_post_ra>
// kernel: diff_unpool.1
= control target key start
LH: loop header
LB: loop body
LE: loop exit
PB: predicated region body
PF: predicated region fallthrough
CT: control target
= control target key end

     0   :  { %11 = vsyncpa [#allocation3], 0  ;;  %s1020_s0 = inlined_call_operand.vmem [shape: f32[2,32,128], index: 0, kind: input, shape index: {}]   ;;  %s1021_s1 = inlined_call_operand.vmem [shape: bf16[2,32,8], index: 1, kind: input, shape index: {}]   ;;  %s1022_s2 = inlined_call_operand.vmem [shape: bf16[8,32], index: 2, kind: input, shape index: {}]   ;;  %s1023_s3 = inlined_call_operand.vmem [shape: f32[8,1], index: 3, kind: input, shape index: {}]   ;;  %s1024_s4 = inlined_call_operand.vmem [shape: f32[32,1], index: 4, kind: input, shape index: {}]   ;;  %s1025_s5 = inlined_call_operand.vmem [shape: f32[32,1], index: 5, kind: input, shape index: {}]   ;;  %s1026_s6 = inlined_call_operand.hbm [shape: f32[2,32,128], index: 6, kind: output, shape index: {}]  }
   0x1   :  { %13 = vsyncpa [#allocation3 + $0x1], 0  ;;  %s854_s21 = smov 0   ;;  %s856_s22 = smov 0  }
   0x2   :  { %s858_s23 = smov 0   ;;  %s860_s24 = smov 0  }
   0x3 LB: > { %s875_s25 = sadd.s32 4294967295, %s811_s24   ;;  %s646_s26 = sadd.s32 4294967294, %s811_s24   ;;  %s811_s24 = sphi %s860_s24, %s1032_s24   ;;  %s807_s23 = sphi %s858_s23, %s1031_s23   ;;  %s803_s22 = sphi %s856_s22, %s1030_s22   ;;  %s799_s21 = sphi %s854_s21, %s1029_s21  }
   0x4   : > { %s879_s27 = sadd.s32 1, %s811_s24   ;;  %s162_s28 = sadd.s32 1, %s807_s23 }
   0x5   : > { %s159_s29 = ssub.s32 %s811_s24, %s879_s27  ;;  %p172_p0 = scmp.ne.s32.totalorder %s807_s23, %s803_s22 }
   0x6   : > { %p160_p1 = scmp.eq.s32.totalorder %s159_s29, 0  ;;  %p173_p2 = scmp.eq.s32.totalorder %s875_s25, 1 }
   0x7   : > { %p178_p3 = scmp.ne.s32.totalorder %s803_s22, %s799_s21  ;;  %p179_p4 = scmp.eq.s32.totalorder %s646_s26, 1 }
   0x8   : > { %s890_s30 = scalar_select %p160_p1, %s807_s23, %s162_s28  }
   0x9   : > { %p892_p5 = por %p173_p2, %p172_p0  ;;  %p896_p6 = por %p179_p4, %p178_p3 }
   0xa   : > { %p649_p7 = scmp.ge.s32.totalorder %s811_s24, 1  ;;  %p225_p8 = scmp.lt.s32.totalorder %s811_s24, 3 }
   0xc   : > { %p226_p9 = pnand %p649_p7, %p225_p8 }
   0xd   : > { %p260_p10 = scmp.lt.s32.totalorder (!%p226_p9), %s875_s25, 1  ;;  %v813_v8 = vmov (!%p226_p9), 0   ;;  %v273_v41 = vld [vmem:[%s1024_s4] sm:$0xff] (!%p226_p9)  ;;  %v274_v44 = vld [vmem:[%s1024_s4 + $0x8] sm:$0xff] (!%p226_p9)  ;;  %v275_v47 = vld [vmem:[%s1024_s4 + $0x10] sm:$0xff] (!%p226_p9)  ;;  %vm815_vm0 = vmmov (!%p226_p9), 0  }
   0xe   : > { %229 = sbr.rel (%p226_p9) target bundleno = 837 (0x345), region = 44  ;;  %733 = vset.pattern.permute.xlu0 (!%p226_p9), %v813_v8  ;;  %734 = vset.pattern.permute.xlu1 (!%p226_p9), %v813_v8  ;;  %v276_v51 = vld [vmem:[%s1024_s4 + $0x18] sm:$0xff] (!%p226_p9)  ;;  %v277_v54 = vld [vmem:[%s1025_s5] sm:$0xff] (!%p226_p9)  ;;  %v278_v57 = vld [vmem:[%s1025_s5 + $0x8] sm:$0xff] (!%p226_p9)  ;;  %vm416_vm1 = vcmask (!%p226_p9), 261120   ;;  %vm490_vm2 = vcmask (!%p226_p9), 64512  }
   0xf   : > { %v279_v60 = vld [vmem:[%s1025_s5 + $0x10] sm:$0xff] (!%p226_p9)  ;;  %v280_v63 = vld [vmem:[%s1025_s5 + $0x18] sm:$0xff] (!%p226_p9)  ;;  %vm497_vm3 = vcmask (!%p226_p9), 1043456   ;;  %s816_s18 = smov (!%p226_p9), [#allocation2]  }
  0x10   : > { %s753_s19 = sshll.u32 (!%p226_p9), %s816_s18, 4  ;;  %s754_s19 = int_to_ptr.vmem [resolvable:$false] %s753_s19 }
  0x15   : > { %s904_s9 = scalar_select %p260_p10, %s875_s25, 1 }
  0x17   : > { %s665_s10 = sshll.u32 %s904_s9, 5  ;;  %s666_s20 = sshll.u32 %s904_s9, 4 }
  0x18   : > { %s264_s13 = scalar_lea.vmem %s1020_s0, %s665_s10  ;;  %s269_s29 = scalar_lea.vmem %s1021_s1, %s666_s20 }
  0x19   : > { %v910_v0 = vld [vmem:[%s264_s13 + $0x18] sm:$0xff]  ;;  %v912_v1 = vld [vmem:[%s264_s13] sm:$0xff]  ;;  %v918_v3 = vld [vmem:[%s264_s13 + $0x8] sm:$0xff]  ;;  %s257_s9 = sand.u32 1, %s803_s22   ;;  %s755_s20 = scalar_lea.vmem %s754_s19, 1024 }
  0x1a   : > { %295 = vadd.xlane.f32.xlu1 %v910_v0  ;;  %289 = vadd.xlane.f32.xlu0 %v912_v1  ;;  %v301_v2 = vmul.f32 %v912_v1, %v912_v1  ;;  %v302_v4 = vmul.f32 %v918_v3, %v918_v3  ;;  %v923_v5 = vld [vmem:[%s264_s13 + $0x10] sm:$0xff]  ;;  %v304_v7 = vmul.f32 %v910_v0, %v910_v0  ;;  %s650_s10 = sshll.u32 %s257_s9, 5  ;;  %s667_s13 = sshll.u32 %s875_s25, 9 }
  0x1b   : > { %v303_v6 = vmul.f32 %v923_v5, %v923_v5  ;;  %s259_s11 = scalar_lea.vmem [#allocation2], %s650_s10  ;;  %s977_s16 = scalar_lea.hbm %s1026_s6, %s667_s13 }
  0x1c   : > { %s572_s12 = sshll.u32 %s259_s11, 4  ;;  %s979_s25 = scalar_lea.sflag [#allocation3], %s257_s9  ;;  %s972_s12 = int_to_ptr.vmem [resolvable:$true] %s572_s12 }
  0x1d   : > { %s749_s17 = scalar_lea.vmem %s972_s12, 512  ;;  %p756_p0 = scmp.lt.s32.totalorder %s972_s12, %s754_s19 }
  0x1e   : > { %291 = vadd.xlane.f32.xlu0 %v918_v3  ;;  %305 = vadd.xlane.f32.xlu1 %v301_v2  ;;  %p750_p11 = scmp.ne.s32.totalorder %s972_s12, %s749_s17  ;;  %p757_p1 = scmp.lt.s32.totalorder %s755_s20, %s749_s17 }
  0x20   : > { %p751_p12 = pnand %p750_p11, %p892_p5  ;;  %p758_p2 = por %p757_p1, %p756_p0 }
  0x22   : > { %293 = vadd.xlane.f32.xlu0 %v923_v5  ;;  %307 = vadd.xlane.f32.xlu1 %v302_v4  ;;  %v814_v4 = vmov 0.0   ;;  %p752_p13 = pneg %p751_p12 }
  0x23   : > { %674 = vmatprep.subr.bf16.mxu0 %v814_v4  ;;  %678 = vmatprep.mubr.msk.bf16.mxu0 %vm815_vm0, %v814_v4 }
  0x24   : > { %p759_p3 = pnand %p758_p2, %p752_p13 }
  0x26   : > { %309 = vadd.xlane.f32.xlu0 %v303_v6  ;;  %311 = vadd.xlane.f32.xlu1 %v304_v7  ;;  %v272_v6 = vld [vmem:[%s1023_s3] sm:$0xff] }
  0xa7   : > { %v296_v9 = vpop.xlane.xlu1 %295  ;;  %v290_v10 = vpop.xlane.xlu0 %289 }
  0xa8   : > { %v317_v11 = vmul.f32 0.0078125, %v290_v10  ;;  %v320_v18 = vmul.f32 0.0078125, %v296_v9 }
  0xaa   : > { %v325_v14 = vmul.f32 %v317_v11, %v317_v11  ;;  %v328_v27 = vmul.f32 %v320_v18, %v320_v18 }
  0xab   : > { %v292_v12 = vpop.xlane.xlu0 %291  ;;  %v306_v13 = vpop.xlane.xlu1 %305 }
  0xac   : > { %v318_v15 = vmul.f32 0.0078125, %v292_v12  ;;  %v321_v16 = vmul.f32 0.0078125, %v306_v13 }
  0xae   : > { %v329_v17 = vsub.f32 %v321_v16, %v325_v14  ;;  %v326_v21 = vmul.f32 %v318_v15, %v318_v15 }
  0xaf   : > { %v294_v19 = vpop.xlane.xlu0 %293  ;;  %v308_v20 = vpop.xlane.xlu1 %307 }
  0xb0   : > { %v333_v22 = vmax.f32 %v329_v17, 0.0  ;;  %v319_v23 = vmul.f32 0.0078125, %v294_v19  ;;  %v322_v24 = vmul.f32 0.0078125, %v308_v20 }
  0xb2   : > { %v337_v25 = vadd.f32 0.001, %v333_v22  ;;  %v330_v26 = vsub.f32 %v322_v24, %v326_v21  ;;  %v327_v28 = vmul.f32 %v319_v23, %v319_v23 }
  0xb3   : > { %v310_v29 = vpop.xlane.xlu0 %309  ;;  %v312_v30 = vpop.xlane.xlu1 %311 }
  0xb4   : > { %737 = vrsqrt.f32 %v337_v25  ;;  %v334_v31 = vmax.f32 %v330_v26, 0.0  ;;  %v323_v32 = vmul.f32 0.0078125, %v310_v29  ;;  %v324_v33 = vmul.f32 0.0078125, %v312_v30 }
  0xb6   : > { %v338_v34 = vadd.f32 0.001, %v334_v31  ;;  %v331_v35 = vsub.f32 %v323_v32, %v327_v28  ;;  %v332_v36 = vsub.f32 %v324_v33, %v328_v27  ;;  %v271_v27 = vld [vmem:[%s1022_s2] sm:$0xf] }
  0xb8   : > { %739 = vrsqrt.f32 %v338_v34  ;;  %v335_v37 = vmax.f32 %v331_v35, 0.0  ;;  %v336_v38 = vmax.f32 %v332_v36, 0.0 }
  0xba   : > { %v339_v39 = vadd.f32 0.001, %v335_v37  ;;  %v340_v40 = vadd.f32 0.001, %v336_v38 }
  0xbc   : > { %741 = vrsqrt.f32 %v339_v39 }
  0xbd   : > { %743 = vrsqrt.f32 %v340_v40 }
  0xbe   : > { %v738_v42 = vpop.eup %737 }
  0xbf   : > { %v345_v43 = vmul.f32 %v738_v42, %v273_v41 }
  0xc1   : > { %359 = vperm.xlu0 %733, %v345_v43   ;;  %v349_v53 = vmul.f32 %v345_v43, %v317_v11 }
  0xc2   : > { %v740_v45 = vpop.eup %739 }
  0xc3   : > { %v346_v46 = vmul.f32 %v740_v45, %v274_v44  ;;  %v353_v55 = vsub.f32 %v277_v54, %v349_v53  ;;  %v736_v44 = vld [vmem:[%s269_s29 + $0x8] sm:$0xff]  }
  0xc5   : > { %364 = vperm.xlu1 %734, %v346_v46   ;;  %v350_v56 = vmul.f32 %v346_v46, %v318_v15 }
  0xc6   : > { %v742_v48 = vpop.eup %741 }
  0xc7   : > { %v347_v49 = vmul.f32 %v742_v48, %v275_v47  ;;  %v744_v50 = vpop.eup %743  ;;  %v354_v58 = vsub.f32 %v278_v57, %v350_v56 }
  0xc8   : > { %v348_v52 = vmul.f32 %v744_v50, %v276_v51 }
  0xc9   : > { %369 = vperm.xlu1 %734, %v347_v49   ;;  %v351_v59 = vmul.f32 %v347_v49, %v319_v23 }
  0xca   : > { %v352_v62 = vmul.f32 %v348_v52, %v320_v18 }
  0xcb   : > { %v355_v61 = vsub.f32 %v279_v60, %v351_v59 }
  0xcc   : > { %v356_v2 = vsub.f32 %v280_v63, %v352_v62 }
  0xcd   : > { %374 = vperm.xlu1 %734, %v348_v52  }
  0xd1   : > { %383 = vperm.xlu1 %734, %v353_v55  }
  0xd5   : > { %388 = vperm.xlu1 %734, %v354_v58  }
  0xd9   : > { %393 = vperm.xlu1 %734, %v355_v61  }
  0xdd   : > { %398 = vperm.xlu1 %734, %v356_v2  }
  0xe1   : > { %413 = vperm.xlu1 %734, %v272_v6  }
 0x140   : > { %v360_v10 = vpop.permute.xlu0 %359 }
 0x141   : > { %v377_v12 = vmul.f32 %v360_v10, %v912_v1 }
 0x144   : > { %v365_v7 = vpop.permute.xlu1 %364 }
 0x145   : > { %v378_v13 = vmul.f32 %v365_v7, %v918_v3 }
 0x148   : > { %v370_v8 = vpop.permute.xlu1 %369 }
 0x149   : > { %v379_v20 = vmul.f32 %v370_v8, %v923_v5 }
 0x14c   : > { %v375_v9 = vpop.permute.xlu1 %374 }
 0x14d   : > { %v380_v22 = vmul.f32 %v375_v9, %v910_v0  ;;  %v735_v0 = vld [vmem:[%s269_s29] sm:$0xff]  }
 0x14e   : > { %684 = vmatprep.mubr.msk.bf16.mxu1 %vm490_vm2, %v735_v0 }
 0x150   : > { %v384_v11 = vpop.permute.xlu1 %383 }
 0x151   : > { %v401_v14 = vadd.f32 %v384_v11, %v377_v12 }
 0x153   : > { %v405_v17 = vmax.f32 %v401_v14, 0.0 }
 0x154   : > { %v389_v15 = vpop.permute.xlu1 %388 }
 0x155   : > { %v402_v16 = vadd.f32 %v389_v15, %v378_v13 }
 0x157   : > { %v406_v18 = vmax.f32 %v402_v16, 0.0 }
 0x158   : > { %v394_v19 = vpop.permute.xlu1 %393 }
 0x159   : > { %v409_v21 = vpack.c.bf16 %v406_v18, %v405_v17  ;;  %v403_v23 = vadd.f32 %v394_v19, %v379_v20 }
 0x15b   : > { %675 = vmatpush3.bf16.msra.mxu0 %v409_v21  ;;  %v407_v1 = vmax.f32 %v403_v23, 0.0 }
 0x15c   : > { %v399_v24 = vpop.permute.xlu1 %398  ;;  %676 = vmatprep.subr.bf16.mxu0 %v814_v4 }
 0x15d   : > { %v404_v25 = vadd.f32 %v399_v24, %v380_v22 }
 0x15f   : > { %v408_v26 = vmax.f32 %v404_v25, 0.0 }
 0x160   : > { %v414_v5 = vpop.permute.xlu1 %413 }
 0x161   : > { %v410_v3 = vpack.c.bf16 %v408_v26, %v407_v1 }
 0x163   : > { %677 = vmatpush3.bf16.msra.mxu0 %v410_v3 }
 0x166   : > { %679 = vmatmul.mubr.msk.bf16.vlgmr.msra.gmra.mrb[0].mxu0 %vm416_vm1, %v271_v27 }
 0x239   : > { %v454_v28 = vpop.f32.mrb[0].mxu0 }
 0x23a   : > { %v455_v29 = vadd.f32 %v454_v28, %v414_v5  ;;  %v680_v30 = vpop.f32.mrb[1].mxu0 }
 0x23b   : > { %v457_v31 = vpop.f32.mrb[2].mxu0 }
 0x23c   : > { %v460_v32 = vrot.slane %v455_v29, 4  ;;  %v681_v33 = vpop.f32.mrb[3].mxu0 }
 0x23e   : > { %v461_v34 = vmax.f32 %v455_v29, %v460_v32 }
 0x240   : > { %v462_v35 = vrot.slane %v461_v34, 2 }
 0x242   : > { %v463_v36 = vmax.f32 %v461_v34, %v462_v35 }
 0x244   : > { %v464_v37 = vrot.slane %v463_v36, 1 }
 0x246   : > { %v465_v38 = vmax.f32 %v463_v36, %v464_v37 }
 0x248   : > { %v466_v39 = vsub.f32 %v455_v29, %v465_v38 }
 0x24a   : > { %v467_v40 = vmul.f32 1.442695, %v466_v39 }
 0x24c   : > { %745 = vpow2.f32 %v467_v40 }
 0x256   : > { %v746_v41 = vpop.eup %745 }
 0x257   : > { %v479_v42 = vpack.c.bf16 %v746_v41, %v746_v41  ;;  %v469_v45 = vrot.slane %v746_v41, 4 }
 0x259   : > { %688 = vmatprep.subr.msk.bf16.mxu1 %vm497_vm3, %v479_v42  ;;  %v499_v43 = vsel %vm497_vm3, %v479_v42, 0  ;;  %v470_v46 = vadd.f32 %v746_v41, %v469_v45 }
 0x25a   : > { %683 = vmatpush3.bf16.msra.mxu1 %v499_v43 }
 0x25b   : > { %v471_v47 = vrot.slane %v470_v46, 2 }
 0x25d   : > { %685 = vmatmul.mubr.msk.bf16.vlgmr.msra.gmra.mrb[0].mxu1 %vm490_vm2, %v736_v44  ;;  %v472_v48 = vadd.f32 %v471_v47, %v470_v46 }
 0x25f   : > { %v473_v49 = vrot.slane %v472_v48, 1 }
 0x261   : > { %v474_v50 = vadd.f32 %v473_v49, %v472_v48 }
 0x263   : > { %747 = vrcp.f32 %v474_v50 }
 0x26d   : > { %v748_v51 = vpop.eup %747 }
 0x26e   : > { %v476_v52 = vmul.f32 %v748_v51, %v474_v50 }
 0x270   : > { %v477_v53 = vsub.f32 2.0, %v476_v52 }
 0x272   : > { %v478_v54 = vmul.f32 %v748_v51, %v477_v53 }
 0x330   : > { %v686_v55 = vpop.f32.mrb[0].mxu1 }
 0x331   : > { %v552_v56 = vmul.f32 %v686_v55, %v478_v54  ;;  %v535_v57 = vpop.f32.mrb[1].mxu1 }
 0x332   : > { %v550_v58 = vmul.f32 %v535_v57, %v478_v54  ;;  %v687_v59 = vpop.f32.mrb[2].mxu1 }
 0x333   : > { %556 = vst [vmem:[%s259_s11 + $0x10] sm:$0xff] %v552_v56  ;;  %v553_v60 = vmul.f32 %v687_v59, %v478_v54  ;;  %v538_v61 = vpop.f32.mrb[3].mxu1 }
 0x334   : > { %554 = vst [vmem:[%s259_s11] sm:$0xff] %v550_v58  ;;  %v551_v62 = vmul.f32 %v538_v61, %v478_v54 }
 0x335   : > { %557 = vst [vmem:[%s259_s11 + $0x18] sm:$0xff] %v553_v60 }
 0x336   : > { %555 = vst [vmem:[%s259_s11 + $0x8] sm:$0xff] %v551_v62 }
 0x337   : > { %762 = shalt.err (!%p759_p3)
}
 0x338   : > { %s763_s26 = scalar_lea.hbm %s977_s16, 512  ;;  %s767_s9 = scalar_lea.hbm %s1026_s6, 1024 }
 0x339   : > { %p764_p4 = scmp.ne.s32.totalorder %s977_s16, %s763_s26  ;;  %p768_p9 = scmp.lt.u32.totalorder %s977_s16, %s1026_s6 }
 0x33a   : > { %p769_p10 = scmp.lt.u32.totalorder %s767_s9, %s763_s26  ;;  %p771_p12 = scmp.lt.u32.totalorder %s763_s26, %s977_s16 }
 0x33b   : > { %p765_p7 = pnand %p764_p4, %p892_p5 }
 0x33c   : > { %p770_p11 = por %p769_p10, %p768_p9 }
 0x33d   : > { %p766_p8 = pneg %p765_p7 }
 0x33e   : > { %p772_p13 = por %p771_p12, %p770_p11 }
 0x340   : > { %p773_p0 = pnand %p772_p13, %p766_p8 }
 0x342   : > { %776 = shalt.err (!%p773_p0)
}
 0x343   : > { %s817_s13 = smov 128   ;;  %s818_s14 = smov 8  }
 0x344   : > { %689 = dma.vmem_to_hbm [thread:$0]  (%p892_p5), %s972_s12, 512, %s977_s16, %s979_s25, %s817_s13, %s817_s13, %s818_s14  }
 0x345 PF: > { %p695_p1 = scmp.ge.s32.totalorder %s811_s24, 2  ;;  %s587_s15 = sand.u32 1, %s799_s21  }
 0x346   : > { %s588_s17 = scalar_lea.sflag [#allocation3], %s587_s15 }
 0x347   : > { %p692_p2 = pnand %p695_p1, %p896_p6 }
 0x349   : > { %794 = dma.done.wait (!%p692_p2), %s588_s17, 512  }
 0x34a   : > { %796 = vsyncadd (!%p692_p2), %s588_s17, 4294966784  ;;  %p16_p3 = scmp.ge.s32.totalorder %s879_s27, 4   ;;  %s1029_s21 = smov %s803_s22 }
 0x34b   : > { %s1030_s22 = smov %s807_s23  ;;  %s1031_s23 = smov %s890_s30 }
 0x34c   : > { %s1032_s24 = smov %s879_s27  ;;  %18 = sbr.rel (!%p16_p3) target bundleno = 3 (0x3), region = 82 }
 0x353   :  { %593 = vsyncpa [#allocation3], 1 }
 0x354   :  { %595 = vsyncpa [#allocation3 + $0x1], 1 }

</bundles_post_ra>
